<compile_context>
chip_gen: v5e
topology: v5e:2x2
jax: 0.10.0
libtpu: 0.0.40
codegen_flags: <defaults>
</compile_context>

<pallas_src>
import math

import jax
import jax.numpy as jnp
import numpy as np
from jax.experimental import pallas as pl
from jax.experimental.pallas import tpu as pltpu


_FAST_PATH_BYTES = 2 * 1024 * 1024      # x + pe + out live bytes below this -> one program
_TILE_BUDGET_BYTES = 24 * 1024 * 1024   # total live VMEM for 3 streams x 2 buffers
_VMEM_LIMIT_BYTES = 48 * 1024 * 1024    # explicit scoped-VMEM cap (<= v7x 64 MiB physical)


# ----------------------------------------------------------------------------
# Positional-encoding table (the registered buffer `pe` of the PyTorch module)
# ----------------------------------------------------------------------------
def make_positional_encoding(max_len, d_model):
    position = np.arange(max_len, dtype=np.float32)[:, None]                # (L, 1)
    div_term = np.exp(
        np.arange(0, d_model, 2, dtype=np.float32) * (-math.log(10000.0) / d_model)
    )                                                                        # (D/2,)
    pe = np.zeros((max_len, d_model), dtype=np.float32)
    pe[:, 0::2] = np.sin(position * div_term)
    pe[:, 1::2] = np.cos(position * div_term)
    return jnp.asarray(pe)                                                   # (max_len, D)


def _sublane_multiple(dtype):
    return {4: 8, 2: 16, 1: 32}.get(jnp.dtype(dtype).itemsize, 8)


# ----------------------------------------------------------------------------
# Kernels (shared by all dispatch paths; pe block broadcasts against x block)
# ----------------------------------------------------------------------------
def _add_pe_kernel(x_ref, pe_ref, o_ref):
    o_ref[...] = (x_ref[...] + pe_ref[...]).astype(o_ref.dtype)


def _make_dropout_kernel(keep_prob, n_grid_axes):
    inv_keep = 1.0 / keep_prob

    def kernel(seed_ref, x_ref, pe_ref, o_ref):
        # Distinct PRNG stream per grid step.
        step = pl.program_id(0)
        for ax in range(1, n_grid_axes):
            step = step * pl.num_programs(ax) + pl.program_id(ax)
        pltpu.prng_seed(seed_ref[0] + step)

        y = x_ref[...] + pe_ref[...]
        bits = pltpu.prng_random_bits(y.shape)
        mask = jnp.asarray((1 << 23) - 1, dtype=bits.dtype)
        # uniform in [0, 1) from the low 23 bits (sign-safe regardless of bits dtype)
        u = jnp.bitwise_and(bits, mask).astype(jnp.float32) * (1.0 / float(1 << 23))
        keep = u < keep_prob
        y = jnp.where(keep, y * inv_keep, jnp.zeros_like(y))
        o_ref[...] = y.astype(o_ref.dtype)

    return kernel


def _kernel_and_extras(apply_dropout, keep_prob, seed_arr, n_grid_axes):
    if apply_dropout:
        kernel = _make_dropout_kernel(keep_prob, n_grid_axes)
        extra_inputs = (seed_arr,)
        extra_specs = [pl.BlockSpec(memory_space=pltpu.MemorySpace.SMEM)]
    else:
        kernel = _add_pe_kernel
        extra_inputs, extra_specs = (), []
    return kernel, extra_inputs, extra_specs


# ----------------------------------------------------------------------------
# Tile-size selection (dtype aware)
# ----------------------------------------------------------------------------
def _choose_row_tile(L, D, itemsize, sub, budget_bytes=_TILE_BUDGET_BYTES):
    per_block = budget_bytes // (3 * 2)            # 3 streams, double-buffered
    rows = per_block // max(1, D * itemsize)
    if rows >= L:
        return L
    return max(sub, (rows // sub) * sub)


def _choose_batch_tile(B, LD, itemsize, sub, budget_bytes=_TILE_BUDGET_BYTES):
    per_block = budget_bytes // (3 * 2)
    rows = per_block // max(1, LD * itemsize)
    if rows < sub:
        return None                                 # row too wide; caller falls back
    if rows >= B:
        return B
    return (rows // sub) * sub


# ----------------------------------------------------------------------------
# Dispatch paths
# ----------------------------------------------------------------------------
def _single_block_path(x, pe_cast, apply_dropout, keep_prob, seed_arr):
    # Whole problem in one program; flattening makes the store lane-dense even
    # when d_model < 128 (the shipped D=32 config).
    B, L, D = x.shape
    LD = L * D
    x2 = x.reshape(B, LD)                           # contiguous reshape, free
    pe2 = pe_cast[:L].reshape(1, LD)                # tiny (<= max_len * D elements)

    kernel, extra_inputs, extra_specs = _kernel_and_extras(
        apply_dropout, keep_prob, seed_arr, n_grid_axes=1)

    out = pl.pallas_call(
        kernel,
        out_shape=jax.ShapeDtypeStruct((B, LD), x.dtype),
        grid=(1,),
        in_specs=extra_specs + [
            pl.BlockSpec((B, LD), lambda i: (0, 0)),
            pl.BlockSpec((1, LD), lambda i: (0, 0)),
        ],
        out_specs=pl.BlockSpec((B, LD), lambda i: (0, 0)),
    )(*extra_inputs, x2, pe2)
    return out.reshape(B, L, D)


def _tiled_3d_path(x, pe_cast, apply_dropout, keep_prob, seed_arr, row_tile):
    # Row-tiled over L with batch as the INNER grid axis: the pe block index
    # (l, 0) is constant across the inner batch sweep, so Pallas fetches each
    # pe tile once instead of B times. pe_full is passed unsliced.
    B, L, D = x.shape
    itemsize = jnp.dtype(x.dtype).itemsize
    sub = _sublane_multiple(x.dtype)

    TL = row_tile if row_tile is not None else _choose_row_tile(L, D, itemsize, sub)
    pe_arr = pe_cast
    if TL >= L:
        TL = L
        if L % sub != 0 and L != pe_arr.shape[0]:
            pe_arr = pe_arr[:L]          # only when needed so the pe block == full dim
    # else: TL is a multiple of the sublane quantum; the last (partial) row-tile
    # may read pe rows past L — those are only added to x rows that are never stored.
    n_l = pl.cdiv(L, TL)

    kernel, extra_inputs, extra_specs = _kernel_and_extras(
        apply_dropout, keep_prob, seed_arr, n_grid_axes=2)

    return pl.pallas_call(
        kernel,
        out_shape=jax.ShapeDtypeStruct((B, L, D), x.dtype),
        grid=(n_l, B),
        in_specs=extra_specs + [
            pl.BlockSpec((None, TL, D), lambda l, b: (b, l, 0)),   # x[b, l-tile, :]
            pl.BlockSpec((TL, D), lambda l, b: (l, 0)),            # pe[l-tile, :] (reused over b)
        ],
        out_specs=pl.BlockSpec((None, TL, D), lambda l, b: (b, l, 0)),
        compiler_params=pltpu.CompilerParams(
            dimension_semantics=("parallel", "parallel"),
            vmem_limit_bytes=_VMEM_LIMIT_BYTES,
        ),
    )(*extra_inputs, x, pe_arr)


def _flat_tiled_path(x, pe_cast, apply_dropout, keep_prob, seed_arr, batch_tile):
    # d_model < 128 on a large tensor: flatten (L, D) into one lane-dense axis,
    # tile only the batch dim; the single pe row has a constant block index so
    # it is DMA'd exactly once.
    B, L, D = x.shape
    LD = L * D
    x2 = x.reshape(B, LD)
    pe2 = pe_cast[:L].reshape(1, LD)
    itemsize = jnp.dtype(x.dtype).itemsize
    sub = _sublane_multiple(x.dtype)

    TB = batch_tile if batch_tile is not None else _choose_batch_tile(B, LD, itemsize, sub)
    TB = min(TB, B)
    n_b = pl.cdiv(B, TB)

    kernel, extra_inputs, extra_specs = _kernel_and_extras(
        apply_dropout, keep_prob, seed_arr, n_grid_axes=1)

    out = pl.pallas_call(
        kernel,
        out_shape=jax.ShapeDtypeStruct((B, LD), x.dtype),
        grid=(n_b,),
        in_specs=extra_specs + [
            pl.BlockSpec((TB, LD), lambda b: (b, 0)),
            pl.BlockSpec((1, LD), lambda b: (0, 0)),     # constant -> fetched once
        ],
        out_specs=pl.BlockSpec((TB, LD), lambda b: (b, 0)),
        compiler_params=pltpu.CompilerParams(
            dimension_semantics=("parallel",),
            vmem_limit_bytes=_VMEM_LIMIT_BYTES,
        ),
    )(*extra_inputs, x2, pe2)
    return out.reshape(B, L, D)


# ----------------------------------------------------------------------------
# Public forward
# ----------------------------------------------------------------------------
def positional_encoding_forward(x, pe_full, *, dropout_p=0.0, training=False, seed=0,
                                force_tiled=False, row_tile=None, batch_tile=None):
    """x: (B, L, D); pe_full: (max_len, D). Returns dropout(x + pe[:L])."""
    if x.ndim != 3:
        raise ValueError(f"expected (batch, seq, d_model) input, got {x.shape}")
    B, L, D = x.shape
    max_len, d_model = pe_full.shape
    if D != d_model:
        raise ValueError(f"d_model mismatch: x has {D}, pe has {d_model}")
    if L > max_len:
        raise ValueError(f"sequence length {L} exceeds max_len {max_len}")

    pe_cast = pe_full if pe_full.dtype == x.dtype else pe_full.astype(x.dtype)
    itemsize = jnp.dtype(x.dtype).itemsize
    sub = _sublane_multiple(x.dtype)

    apply_dropout = bool(training) and float(dropout_p) > 0.0
    keep_prob = 1.0 - float(dropout_p)
    if apply_dropout and keep_prob <= 0.0:
        return jnp.zeros_like(x)                         # p == 1.0 zeroes everything
    seed_arr = jnp.asarray([seed], dtype=jnp.int32) if apply_dropout else None

    total_bytes = 3 * B * L * D * itemsize
    if not force_tiled and total_bytes <= _FAST_PATH_BYTES:
        return _single_block_path(x, pe_cast, apply_dropout, keep_prob, seed_arr)

    if D < 128:
        TB = batch_tile if batch_tile is not None else _choose_batch_tile(
            B, L * D, itemsize, sub)
        if TB is not None:
            return _flat_tiled_path(x, pe_cast, apply_dropout, keep_prob, seed_arr, TB)

    return _tiled_3d_path(x, pe_cast, apply_dropout, keep_prob, seed_arr, row_tile)


# ----------------------------------------------------------------------------
# Module wrapper
# ----------------------------------------------------------------------------
class PositionalEncodingPallas:
    def __init__(self, d_model, dropout=0.1, max_len=20):
        self.d_model = d_model
        self.dropout_p = dropout
        self.max_len = max_len
        self.pe = make_positional_encoding(max_len, d_model)      # (max_len, d_model)

    def __call__(self, x, *, training=False, seed=0):
        # eval (training=False): identity dropout, exactly matches the PyTorch module
        # training=True: fused in-kernel dropout with 1/(1-p) scaling
        return positional_encoding_forward(
            x, self.pe, dropout_p=self.dropout_p, training=training, seed=seed)


# ----------------------------------------------------------------------------
# Self-test
# ----------------------------------------------------------------------------
if __name__ == "__main__":
    key = jax.random.PRNGKey(0)
    k0, k1, k2 = jax.random.split(key, 3)

    # 1) Module-consistent shapes (batch=2, seq=8, hidden=32, max_len=20):
    #    takes the single-program lane-dense fast path.
    B, L, D = 2, 8, 32
    mod = PositionalEncodingPallas(d_model=D, dropout=0.1, max_len=20)
    x = jax.random.normal(k0, (B, L, D), dtype=jnp.float32)
    out = jax.block_until_ready(mod(x))
    ref = x + mod.pe[None, :L, :]
    np.testing.assert_allclose(np.asarray(out), np.asarray(ref), rtol=1e-6, atol=1e-6)

    # 2) Exercise the row-tiled path (batch-inner grid, pe tile reuse, partial blocks).
    B2, L2, D2, ML2 = 3, 40, 256, 48
    pe2 = make_positional_encoding(ML2, D2)
    x2 = jax.random.normal(k1, (B2, L2, D2), dtype=jnp.float32)
    out2 = jax.block_until_ready(
        positional_encoding_forward(x2, pe2, force_tiled=True, row_tile=16))
    np.testing.assert_allclose(np.asarray(out2), np.asarray(x2 + pe2[None, :L2, :]),
                               rtol=1e-6, atol=1e-6)

    # 3) Exercise the lane-dense flattened path (d_model < 128, batch-tiled).
    B3, L3, D3, ML3 = 20, 64, 32, 64
    pe3 = make_positional_encoding(ML3, D3)
    x3 = jax.random.normal(k2, (B3, L3, D3), dtype=jnp.float32)
    out3 = jax.block_until_ready(
        positional_encoding_forward(x3, pe3, force_tiled=True, batch_tile=8))
    np.testing.assert_allclose(np.asarray(out3), np.asarray(x3 + pe3[None, :L3, :]),
                               rtol=1e-6, atol=1e-6)

    print("KERNEL_OK")
</pallas_src>

<mosaic_0001>
module attributes {stable_mosaic.version = 11 : i64} {
  func.func @_add_pe_kernel(%arg0: i32, %arg1: memref<2x256xf32, #tpu.memory_space<vmem>>, %arg2: memref<1x256xf32, #tpu.memory_space<vmem>>, %arg3: memref<2x256xf32, #tpu.memory_space<vmem>>) attributes {dimension_semantics = [#tpu.dimension_semantics<arbitrary>], iteration_bounds = array<i64: 1>, scalar_prefetch = 0 : i64, scratch_operands = 0 : i64, tpu.core_type = #tpu.core_type<tc>, window_params = [{pipeline_mode = #tpu.pipeline_mode<synchronous>, transform_indices = @transform_0, window_bounds = array<i64: 2, 256>}, {pipeline_mode = #tpu.pipeline_mode<synchronous>, transform_indices = @transform_1, window_bounds = array<i64: 1, 256>}, {pipeline_mode = #tpu.pipeline_mode<synchronous>, transform_indices = @transform_2, window_bounds = array<i64: 2, 256>}]} {
    %c0 = arith.constant 0 : index
    %c0_0 = arith.constant 0 : index
    %0 = vector.load %arg1[%c0, %c0_0] : memref<2x256xf32, #tpu.memory_space<vmem>>, vector<2x256xf32>
    %c0_1 = arith.constant 0 : index
    %c0_2 = arith.constant 0 : index
    %1 = vector.load %arg2[%c0_1, %c0_2] : memref<1x256xf32, #tpu.memory_space<vmem>>, vector<1x256xf32>
    %2 = vector.broadcast %1 : vector<1x256xf32> to vector<2x256xf32>
    %3 = arith.addf %0, %2 : vector<2x256xf32>
    %c0_3 = arith.constant 0 : index
    %c0_4 = arith.constant 0 : index
    %4 = vector.load %arg3[%c0_3, %c0_4] : memref<2x256xf32, #tpu.memory_space<vmem>>, vector<2x256xf32>
    tpu.vector_store %arg3[%c0_3, %c0_4], %3 {strides = array<i32>} : memref<2x256xf32, #tpu.memory_space<vmem>>, vector<2x256xf32>,
    return
  }
  func.func @transform_0(%arg0: i32) -> (i32, i32) {
    %c0_i32 = arith.constant 0 : i32
    %c0_i32_0 = arith.constant 0 : i32
    %c0_i32_1 = arith.constant 0 : i32
    return %c0_i32, %c0_i32_0 : i32, i32
  }
  func.func @transform_1(%arg0: i32) -> (i32, i32) {
    %c0_i32 = arith.constant 0 : i32
    %c0_i32_0 = arith.constant 0 : i32
    %c0_i32_1 = arith.constant 0 : i32
    return %c0_i32, %c0_i32_0 : i32, i32
  }
  func.func @transform_2(%arg0: i32) -> (i32, i32) {
    %c0_i32 = arith.constant 0 : i32
    %c0_i32_0 = arith.constant 0 : i32
    %c0_i32_1 = arith.constant 0 : i32
    return %c0_i32, %c0_i32_0 : i32, i32
  }
}

</mosaic_0001>

<bundles_post_ra>
// kernel: tpu_custom_call.1
= control target key start
LH: loop header
LB: loop body
LE: loop exit
PB: predicated region body
PF: predicated region fallthrough
CT: control target
= control target key end

     0   :  { %7 = vsyncpa [#allocation3], 0  ;;  %s177_s0 = inlined_call_operand.hbm [shape: f32[2,256], index: 0, kind: input, shape index: {}]   ;;  %s178_s1 = inlined_call_operand.hbm [shape: f32[1,256], index: 1, kind: input, shape index: {}]   ;;  %s179_s2 = inlined_call_operand.hbm [shape: f32[2,256], index: 2, kind: output, shape index: {}]  }
   0x1   :  { %8 = vsyncpa [#allocation6], 0 }
   0x2   :  { %9 = vsyncpa [#allocation4], 0  ;;  %s15_s11 = sshll.u32 %s177_s0, 4  ;;  %s150_s12 = smov [#allocation2]   ;;  %s16_s11 = int_to_ptr.hbm [resolvable:$true] %s15_s11 }
   0x3   :  { %s17_s13 = sshll.u32 %s150_s12, 4  ;;  %s26_s16 = sshll.u32 %s178_s1, 4  ;;  %s18_s13 = int_to_ptr.vmem [resolvable:$true] %s17_s13  ;;  %s27_s16 = int_to_ptr.hbm [resolvable:$true] %s26_s16 }
   0x4   :  { %20 = dma.hbm_to_vmem [thread:$0]  %s16_s11, 64, %s18_s13, [#allocation3]  }
   0x5   :  { %s151_s17 = smov [#allocation5]  }
   0x6   :  { %s28_s18 = sshll.u32 %s151_s17, 4  ;;  %s29_s18 = int_to_ptr.vmem [resolvable:$true] %s28_s18 }
   0x7   :  { %31 = dma.hbm_to_vmem [thread:$0]  %s27_s16, 32, %s29_s18, [#allocation6]  }
   0x8   :  { %144 = dma.done.wait [#allocation3], 64  }
   0x9   :  { %145 = vsyncadd [#allocation3], 4294967232 }
   0xa   :  { %146 = dma.done.wait [#allocation6], 32  }
   0xb   :  { %147 = vsyncadd [#allocation6], 4294967264  ;;  %v41_v0 = vld [vmem:[#allocation5] sm:$0x3]  ;;  %vm46_vm0 = vcmask 1041408   ;;  %s152_s0 = smov [#allocation7]  }
   0xc   :  { %v43_v1 = vperm.slane %v41_v0, 0  ;;  %v44_v2 = vperm.slane %v41_v0, 1  ;;  %v40_v3 = vld [vmem:[#allocation2] sm:$0xf]  ;;  %s56_s19 = sshll.u32 %s152_s0, 4  ;;  %s58_s21 = sshll.u32 %s179_s2, 4  ;;  %s57_s19 = int_to_ptr.vmem [resolvable:$true] %s56_s19  ;;  %s59_s21 = int_to_ptr.hbm [resolvable:$true] %s58_s21 }
   0xe   :  { %v45_v4 = vrot.slane %v44_v2, 6 }
  0x10   :  { %v47_v5 = vsel %vm46_vm0, %v43_v1, %v45_v4 }
  0x11   :  { %v49_v6 = vadd.f32 %v47_v5, %v40_v3 }
  0x13   :  { %50 = vst [vmem:[#allocation7] sm:$0xf] %v49_v6 }
  0x14   :  { %61 = dma.vmem_to_hbm [thread:$0]  %s57_s19, 64, %s59_s21, [#allocation4]  }
  0x15   :  { %148 = dma.done.wait [#allocation4], 64  }
  0x16   :  { %149 = vsyncadd [#allocation4], 4294967232 }
  0x17   :  { %66 = vsyncpa [#allocation3], 1 }
  0x18   :  { %67 = vsyncpa [#allocation6], 1 }
  0x19   :  { %68 = vsyncpa [#allocation4], 1 }

</bundles_post_ra>
